<compile_context>
chip_gen: v7x
topology: tpu7x:2x2x1
jax: 0.10.0
libtpu: 0.0.40
codegen_flags: <defaults>
</compile_context>

<pallas_src>
import functools

import jax
import jax.numpy as jnp
from jax.experimental import pallas as pl
from jax.experimental.pallas import tpu as pltpu


def _round_up(x, m):
    return ((x + m - 1) // m) * m


# ----------------------------------------------------------------------------
# Fused kernel, one batch tile per grid step:
#   x_ref    : (bn, L_pad, D)   bf16  embedded tokens, zero-padded along L
#   w_ref    : (Kmax, D, CoP)   bf16  packed conv weights (all branches; zero
#                                     rows for k >= K_j, zero pad channels)
#   bm_ref   : (Lout, CoP)      f32   conv bias where position l is valid for
#                                     the branch owning that column, -1e30 else
#   fc_w_ref : (CoP, Cp)        bf16  fc1 weight (zero pad rows / cols)
#   fc_b_ref : (1, Cp)          f32   fc1 bias (zero pad cols)
#   o_ref    : (bn, Cp)         f32   lane-dense output block
# ----------------------------------------------------------------------------
def _make_cnn_text_kernel(Kmax, Lout):

    def kernel(x_ref, w_ref, bm_ref, fc_w_ref, fc_b_ref, o_ref):
        # Conv for ALL branches as Kmax shifted matmuls straight from x
        # (no im2col scratch round-trip).  bf16 MXU inputs, f32 accumulation.
        y = jnp.einsum("nld,dc->nlc", x_ref[:, 0:Lout, :], w_ref[0],
                       preferred_element_type=jnp.float32)
        for k in range(1, Kmax):                                # static unroll
            y = y + jnp.einsum("nld,dc->nlc",
                               x_ref[:, k:k + Lout, :], w_ref[k],
                               preferred_element_type=jnp.float32)
        # TODO(synk): at production seq lengths, chunk Lout here with a running
        #             max accumulator instead of materializing the full y block.

        # bias + invalid-position mask (-1e30) + ReLU, once for the packed
        # 128-lane block (f32 VPU); invalid / pad lanes end up exactly at 0,
        # which never beats the valid (>=0) values in the max below.
        y = jnp.maximum(y + bm_ref[...][None, :, :], 0.0)
        pooled = jnp.max(y, axis=1)                             # (bn, CoP)

        # fc1 for all branches in one lane-dense matmul + bias.
        out = jnp.dot(pooled.astype(jnp.bfloat16), fc_w_ref[...],
                      preferred_element_type=jnp.float32) + fc_b_ref[...]
        o_ref[...] = out                                        # unmasked store

    return kernel


def _choose_block_n(N, L_pad, D, Lout, CoP, Cp):
    """8-aligned batch tile sized from a VMEM budget, capped so the 'parallel'
    batch axis has >= 2 grid steps (keeps both v7x TensorCores busy)."""
    if N <= 8:
        return N
    bytes_per_row = (2 * (L_pad * D * 2)      # x block, double-buffered, bf16
                     + Lout * CoP * 4         # packed conv block y, f32
                     + 2 * (Cp * 4))          # output block, double-buffered
    budget = 24 * 1024 * 1024                 # fits v7x's 32 MiB scoped VMEM
    cap = max(8, min(1024, (budget // bytes_per_row) // 8 * 8))
    two_steps = max(8, (N // 2) // 8 * 8)
    return min(cap, two_steps)


def cnn_text_pallas(x_emb, w_packed, bias_mask, fc_w, fc_b):
    """x_emb: (N, L_pad, D) bf16 (zero padded along L) -> (N, Cp) f32."""
    N, L_pad, D = x_emb.shape
    Kmax, _, CoP = w_packed.shape
    Lout = bias_mask.shape[0]
    Cp = fc_w.shape[-1]

    block_n = _choose_block_n(N, L_pad, D, Lout, CoP, Cp)
    grid = (pl.cdiv(N, block_n),)

    kernel = _make_cnn_text_kernel(Kmax, Lout)

    return pl.pallas_call(
        kernel,
        out_shape=jax.ShapeDtypeStruct((N, Cp), jnp.float32),
        grid=grid,
        in_specs=[
            pl.BlockSpec((block_n, L_pad, D), lambda i: (i, 0, 0)),
            pl.BlockSpec((Kmax, D, CoP), lambda i: (0, 0, 0)),
            pl.BlockSpec((Lout, CoP), lambda i: (0, 0)),
            pl.BlockSpec((CoP, Cp), lambda i: (0, 0)),
            pl.BlockSpec((1, Cp), lambda i: (0, 0)),
        ],
        out_specs=pl.BlockSpec((block_n, Cp), lambda i: (i, 0)),
        compiler_params=pltpu.CompilerParams(
            dimension_semantics=("parallel",),
            vmem_limit_bytes=48 * 1024 * 1024),
    )(x_emb, w_packed, bias_mask, fc_w, fc_b)


# ----------------------------------------------------------------------------
# Forward pass (glue in plain JAX: embedding gather + bias/mask packing only)
# ----------------------------------------------------------------------------
@functools.partial(jax.jit, static_argnames=("Ks", "Co", "C"))
def cnn_text_forward(tokens, params, *, Ks, Co, C):
    N, L = tokens.shape
    Kmin, Kmax = min(Ks), max(Ks)
    Lout = _round_up(L - Kmin + 1, 8)                    # sublane-aligned
    L_pad = _round_up(Lout + Kmax - 1, 8)                # covers all windows
    CoP = params["conv_w"].shape[-1]

    # TODO(synk): at production V/D fuse this gather into the kernel (scalar-
    #             prefetched tokens + per-row DMA from HBM) to avoid the x_emb
    #             HBM round-trip; kept as XLA glue here.
    x_emb = jnp.take(params["embed"], tokens, axis=0)            # (N, L, D) bf16
    x_emb = jnp.pad(x_emb, ((0, 0), (0, L_pad - L), (0, 0)))     # zero pad L

    # Per-branch conv bias with out-of-range positions / pad channels at -1e30
    # (so relu(y + bm) is exactly 0 where PyTorch's max-pool never looks).
    neg = jnp.float32(-1e30)
    cols = []
    for j, K in enumerate(Ks):
        valid = (jnp.arange(Lout) < (L - K + 1))[:, None]        # (Lout, 1)
        cols.append(jnp.where(valid, params["conv_b"][j][None, :], neg))
    bias_mask = jnp.concatenate(cols, axis=1)                    # (Lout, nB*Co)
    bias_mask = jnp.pad(bias_mask, ((0, 0), (0, CoP - bias_mask.shape[1])),
                        constant_values=-1e30).astype(jnp.float32)

    # TODO(synk): nn.Dropout() is stochastic in train mode; identity here
    #             (eval-mode semantics).
    out = cnn_text_pallas(x_emb, params["conv_w"], bias_mask,
                          params["fc_w"], params["fc_b"])
    return out[:, :C]                                            # strip lane pad


# ----------------------------------------------------------------------------
# Parameter construction (PyTorch layouts) and repacking to kernel layouts
# ----------------------------------------------------------------------------
def init_torch_params(key, V, D, C, Co, Ks):
    keys = jax.random.split(key, 2 * len(Ks) + 3)
    ki = iter(keys)
    embed = 0.1 * jax.random.normal(next(ki), (V, D), jnp.float32)
    convs_w, convs_b = [], []
    for K in Ks:
        # PyTorch Conv2d weight shape (Co, Ci=1, K, D)
        convs_w.append(0.1 * jax.random.normal(next(ki), (Co, 1, K, D), jnp.float32))
        convs_b.append(0.1 * jax.random.normal(next(ki), (Co,), jnp.float32))
    # PyTorch Linear weight shape (C, len(Ks)*Co)
    fc_w = 0.1 * jax.random.normal(next(ki), (C, len(Ks) * Co), jnp.float32)
    fc_b = 0.1 * jax.random.normal(next(ki), (C,), jnp.float32)
    return dict(embed=embed, convs_w=convs_w, convs_b=convs_b, fc_w=fc_w, fc_b=fc_b)


def pack_params(tp, Ks):
    """PyTorch layouts -> packed lane-dense kernel layouts (bf16 MXU operands)."""
    V, D = tp["embed"].shape
    Co = tp["convs_w"][0].shape[0]
    nB = len(Ks)
    Kmax = max(Ks)
    C = tp["fc_w"].shape[0]
    CoP = _round_up(nB * Co, 128)
    Cp = _round_up(C, 128)

    # conv weights: (Co,1,K,D) -> (K,D,Co), concatenated along output channels
    # and zero-padded to a single (Kmax, D, CoP) tensor.
    w_packed = jnp.zeros((Kmax, D, CoP), jnp.float32)
    for j, (K, w_t) in enumerate(zip(Ks, tp["convs_w"])):
        w_kdc = jnp.transpose(w_t[:, 0], (1, 2, 0))              # (K, D, Co)
        w_packed = w_packed.at[:K, :, j * Co:(j + 1) * Co].set(w_kdc)

    conv_b = jnp.stack(tp["convs_b"]).astype(jnp.float32)        # (nB, Co)

    # fc1: (C, nB*Co) -> (nB*Co, C), zero-padded to (CoP, Cp)
    fc_w = jnp.zeros((CoP, Cp), jnp.float32).at[:nB * Co, :C].set(tp["fc_w"].T)
    fc_b = jnp.zeros((1, Cp), jnp.float32).at[0, :C].set(tp["fc_b"])

    return dict(embed=tp["embed"].astype(jnp.bfloat16),
                conv_w=w_packed.astype(jnp.bfloat16),
                conv_b=conv_b,
                fc_w=fc_w.astype(jnp.bfloat16),
                fc_b=fc_b)


# ----------------------------------------------------------------------------
# Pure-JAX f32 reference of the PyTorch forward (eval mode), PyTorch layouts
# ----------------------------------------------------------------------------
def reference_forward(tokens, tp):
    x = jnp.take(tp["embed"], tokens, axis=0)                    # (N, L, D)
    pooled = []
    for w_t, b in zip(tp["convs_w"], tp["convs_b"]):
        Co, _, K, _ = w_t.shape
        Lout = x.shape[1] - K + 1
        acc = jnp.zeros((x.shape[0], Lout, Co), jnp.float32)
        for k in range(K):
            acc = acc + jnp.einsum("nld,cd->nlc", x[:, k:k + Lout, :],
                                   w_t[:, 0, k, :])
        acc = jax.nn.relu(acc + b[None, None, :])
        pooled.append(jnp.max(acc, axis=1))
    feat = jnp.concatenate(pooled, axis=1)                       # (N, nB*Co)
    return feat @ tp["fc_w"].T + tp["fc_b"]


if __name__ == "__main__":
    # Module hyper-parameters (small, consistent with CNN_Text.__init__)
    V, D, C, Ci, Co = 50, 32, 8, 1, 16
    Ks = (3, 4, 5)
    N, L = 2, 16                                                 # batch, seq_len

    key = jax.random.PRNGKey(0)
    k_tok, k_par = jax.random.split(key)
    tokens = jax.random.randint(k_tok, (N, L), 0, V, dtype=jnp.int32)

    torch_params = init_torch_params(k_par, V, D, C, Co, Ks)
    params = pack_params(torch_params, Ks)

    out = jax.block_until_ready(cnn_text_forward(tokens, params, Ks=Ks, Co=Co, C=C))
    ref = reference_forward(tokens, torch_params)

    assert out.shape == (N, C)
    err = float(jnp.max(jnp.abs(out - ref)))
    # bf16 MXU operands vs f32 reference -> small rounding difference expected.
    assert jnp.allclose(out, ref, atol=1e-2, rtol=1e-2), err
    print("KERNEL_OK")
</pallas_src>

<mosaic_0001>
module attributes {stable_mosaic.version = 11 : i64} {
  func.func @kernel(%arg0: i32, %arg1: memref<2x24x32xbf16, #tpu.memory_space<vmem>>, %arg2: memref<5x32x128xbf16, #tpu.memory_space<vmem>>, %arg3: memref<16x128xf32, #tpu.memory_space<vmem>>, %arg4: memref<128x128xbf16, #tpu.memory_space<vmem>>, %arg5: memref<1x128xf32, #tpu.memory_space<vmem>>, %arg6: memref<2x128xf32, #tpu.memory_space<vmem>>) attributes {dimension_semantics = [#tpu.dimension_semantics<parallel>], iteration_bounds = array<i64: 1>, scalar_prefetch = 0 : i64, scratch_operands = 0 : i64, tpu.core_type = #tpu.core_type<tc>, window_params = [{transform_indices = @transform_0, window_bounds = array<i64: 2, 24, 32>}, {pipeline_mode = #tpu.pipeline_mode<synchronous>, transform_indices = @transform_1, window_bounds = array<i64: 5, 32, 128>}, {pipeline_mode = #tpu.pipeline_mode<synchronous>, transform_indices = @transform_2, window_bounds = array<i64: 16, 128>}, {pipeline_mode = #tpu.pipeline_mode<synchronous>, transform_indices = @transform_3, window_bounds = array<i64: 128, 128>}, {pipeline_mode = #tpu.pipeline_mode<synchronous>, transform_indices = @transform_4, window_bounds = array<i64: 1, 128>}, {transform_indices = @transform_5, window_bounds = array<i64: 2, 128>}]} {
    %c0 = arith.constant 0 : index
    %c0_0 = arith.constant 0 : index
    %c0_1 = arith.constant 0 : index
    %0 = vector.load %arg1[%c0, %c0_0, %c0_1] : memref<2x24x32xbf16, #tpu.memory_space<vmem>>, vector<2x16x32xbf16>
    %c0_2 = arith.constant 0 : index
    %c0_3 = arith.constant 0 : index
    %c0_4 = arith.constant 0 : index
    %1 = vector.load %arg2[%c0_2, %c0_3, %c0_4] : memref<5x32x128xbf16, #tpu.memory_space<vmem>>, vector<1x32x128xbf16>
    %2 = vector.shape_cast %1 : vector<1x32x128xbf16> to vector<32x128xbf16>
    "tpu.trace_start"() <{level = 10 : i32, message = "nld,dc->nlc"}> : () -> ()
    %cst = arith.constant dense<0.000000e+00> : vector<2x16x128xf32>
    %3 = tpu.matmul %0, %2, %cst {dimension_numbers = #tpu.dot_dimension_numbers<[2], [0], [0, 1], [1], [0, 0, 0, 1, 1, 1], [], []>} : vector<2x16x32xbf16>, vector<32x128xbf16>, vector<2x16x128xf32> -> vector<2x16x128xf32>
    "tpu.trace_stop"() : () -> ()
    %c0_5 = arith.constant 0 : index
    %c1 = arith.constant 1 : index
    %c0_6 = arith.constant 0 : index
    %4 = vector.load %arg1[%c0_5, %c1, %c0_6] : memref<2x24x32xbf16, #tpu.memory_space<vmem>>, vector<2x16x32xbf16>
    %c1_7 = arith.constant 1 : index
    %c0_8 = arith.constant 0 : index
    %c0_9 = arith.constant 0 : index
    %5 = vector.load %arg2[%c1_7, %c0_8, %c0_9] : memref<5x32x128xbf16, #tpu.memory_space<vmem>>, vector<1x32x128xbf16>
    %6 = vector.shape_cast %5 : vector<1x32x128xbf16> to vector<32x128xbf16>
    "tpu.trace_start"() <{level = 10 : i32, message = "nld,dc->nlc"}> : () -> ()
    %cst_10 = arith.constant dense<0.000000e+00> : vector<2x16x128xf32>
    %7 = tpu.matmul %4, %6, %cst_10 {dimension_numbers = #tpu.dot_dimension_numbers<[2], [0], [0, 1], [1], [0, 0, 0, 1, 1, 1], [], []>} : vector<2x16x32xbf16>, vector<32x128xbf16>, vector<2x16x128xf32> -> vector<2x16x128xf32>
    "tpu.trace_stop"() : () -> ()
    %8 = arith.addf %3, %7 : vector<2x16x128xf32>
    %c0_11 = arith.constant 0 : index
    %c2 = arith.constant 2 : index
    %c0_12 = arith.constant 0 : index
    %9 = vector.load %arg1[%c0_11, %c2, %c0_12] : memref<2x24x32xbf16, #tpu.memory_space<vmem>>, vector<2x16x32xbf16>
    %c2_13 = arith.constant 2 : index
    %c0_14 = arith.constant 0 : index
    %c0_15 = arith.constant 0 : index
    %10 = vector.load %arg2[%c2_13, %c0_14, %c0_15] : memref<5x32x128xbf16, #tpu.memory_space<vmem>>, vector<1x32x128xbf16>
    %11 = vector.shape_cast %10 : vector<1x32x128xbf16> to vector<32x128xbf16>
    "tpu.trace_start"() <{level = 10 : i32, message = "nld,dc->nlc"}> : () -> ()
    %cst_16 = arith.constant dense<0.000000e+00> : vector<2x16x128xf32>
    %12 = tpu.matmul %9, %11, %cst_16 {dimension_numbers = #tpu.dot_dimension_numbers<[2], [0], [0, 1], [1], [0, 0, 0, 1, 1, 1], [], []>} : vector<2x16x32xbf16>, vector<32x128xbf16>, vector<2x16x128xf32> -> vector<2x16x128xf32>
    "tpu.trace_stop"() : () -> ()
    %13 = arith.addf %8, %12 : vector<2x16x128xf32>
    %c0_17 = arith.constant 0 : index
    %c3 = arith.constant 3 : index
    %c0_18 = arith.constant 0 : index
    %14 = vector.load %arg1[%c0_17, %c3, %c0_18] : memref<2x24x32xbf16, #tpu.memory_space<vmem>>, vector<2x16x32xbf16>
    %c3_19 = arith.constant 3 : index
    %c0_20 = arith.constant 0 : index
    %c0_21 = arith.constant 0 : index
    %15 = vector.load %arg2[%c3_19, %c0_20, %c0_21] : memref<5x32x128xbf16, #tpu.memory_space<vmem>>, vector<1x32x128xbf16>
    %16 = vector.shape_cast %15 : vector<1x32x128xbf16> to vector<32x128xbf16>
    "tpu.trace_start"() <{level = 10 : i32, message = "nld,dc->nlc"}> : () -> ()
    %cst_22 = arith.constant dense<0.000000e+00> : vector<2x16x128xf32>
    %17 = tpu.matmul %14, %16, %cst_22 {dimension_numbers = #tpu.dot_dimension_numbers<[2], [0], [0, 1], [1], [0, 0, 0, 1, 1, 1], [], []>} : vector<2x16x32xbf16>, vector<32x128xbf16>, vector<2x16x128xf32> -> vector<2x16x128xf32>
    "tpu.trace_stop"() : () -> ()
    %18 = arith.addf %13, %17 : vector<2x16x128xf32>
    %c0_23 = arith.constant 0 : index
    %c4 = arith.constant 4 : index
    %c0_24 = arith.constant 0 : index
    %19 = vector.load %arg1[%c0_23, %c4, %c0_24] : memref<2x24x32xbf16, #tpu.memory_space<vmem>>, vector<2x16x32xbf16>
    %c4_25 = arith.constant 4 : index
    %c0_26 = arith.constant 0 : index
    %c0_27 = arith.constant 0 : index
    %20 = vector.load %arg2[%c4_25, %c0_26, %c0_27] : memref<5x32x128xbf16, #tpu.memory_space<vmem>>, vector<1x32x128xbf16>
    %21 = vector.shape_cast %20 : vector<1x32x128xbf16> to vector<32x128xbf16>
    "tpu.trace_start"() <{level = 10 : i32, message = "nld,dc->nlc"}> : () -> ()
    %cst_28 = arith.constant dense<0.000000e+00> : vector<2x16x128xf32>
    %22 = tpu.matmul %19, %21, %cst_28 {dimension_numbers = #tpu.dot_dimension_numbers<[2], [0], [0, 1], [1], [0, 0, 0, 1, 1, 1], [], []>} : vector<2x16x32xbf16>, vector<32x128xbf16>, vector<2x16x128xf32> -> vector<2x16x128xf32>
    "tpu.trace_stop"() : () -> ()
    %23 = arith.addf %18, %22 : vector<2x16x128xf32>
    %c0_29 = arith.constant 0 : index
    %c0_30 = arith.constant 0 : index
    %24 = vector.load %arg3[%c0_29, %c0_30] : memref<16x128xf32, #tpu.memory_space<vmem>>, vector<16x128xf32>
    %25 = vector.shape_cast %24 : vector<16x128xf32> to vector<1x16x128xf32>
    %26 = vector.broadcast %25 : vector<1x16x128xf32> to vector<2x16x128xf32>
    %27 = arith.addf %23, %26 : vector<2x16x128xf32>
    %cst_31 = arith.constant 0.000000e+00 : f32
    %28 = vector.broadcast %cst_31 : f32 to vector<2x16x128xf32>
    %29 = arith.maximumf %27, %28 : vector<2x16x128xf32>
    %cst_32 = arith.constant dense<0xFF800000> : vector<2x128xf32>
    %30 = vector.multi_reduction <maximumf>, %29, %cst_32 [1] : vector<2x16x128xf32> to vector<2x128xf32>
    %31 = arith.truncf %30 : vector<2x128xf32> to vector<2x128xbf16>
    %c0_33 = arith.constant 0 : index
    %c0_34 = arith.constant 0 : index
    %32 = vector.load %arg4[%c0_33, %c0_34] : memref<128x128xbf16, #tpu.memory_space<vmem>>, vector<128x128xbf16>
    %cst_35 = arith.constant dense<0.000000e+00> : vector<2x128xf32>
    %33 = tpu.matmul %31, %32, %cst_35 {dimension_numbers = #tpu.dot_dimension_numbers<[1], [0], [0], [1], [0, 0, 1, 1], [], []>} : vector<2x128xbf16>, vector<128x128xbf16>, vector<2x128xf32> -> vector<2x128xf32>
    %c0_36 = arith.constant 0 : index
    %c0_37 = arith.constant 0 : index
    %34 = vector.load %arg5[%c0_36, %c0_37] : memref<1x128xf32, #tpu.memory_space<vmem>>, vector<1x128xf32>
    %35 = vector.broadcast %34 : vector<1x128xf32> to vector<2x128xf32>
    %36 = arith.addf %33, %35 : vector<2x128xf32>
    %c0_38 = arith.constant 0 : index
    %c0_39 = arith.constant 0 : index
    %37 = vector.load %arg6[%c0_38, %c0_39] : memref<2x128xf32, #tpu.memory_space<vmem>>, vector<2x128xf32>
    tpu.vector_store %arg6[%c0_38, %c0_39], %36 {strides = array<i32>} : memref<2x128xf32, #tpu.memory_space<vmem>>, vector<2x128xf32>,
    return
  }
  func.func @transform_0(%arg0: i32) -> (i32, i32, i32) {
    %c0_i32 = arith.constant 0 : i32
    %c0_i32_0 = arith.constant 0 : i32
    %c0_i32_1 = arith.constant 0 : i32
    return %arg0, %c0_i32, %c0_i32_0 : i32, i32, i32
  }
  func.func @transform_1(%arg0: i32) -> (i32, i32, i32) {
    %c0_i32 = arith.constant 0 : i32
    %c0_i32_0 = arith.constant 0 : i32
    %c0_i32_1 = arith.constant 0 : i32
    %c0_i32_2 = arith.constant 0 : i32
    return %c0_i32, %c0_i32_0, %c0_i32_1 : i32, i32, i32
  }
  func.func @transform_2(%arg0: i32) -> (i32, i32) {
    %c0_i32 = arith.constant 0 : i32
    %c0_i32_0 = arith.constant 0 : i32
    %c0_i32_1 = arith.constant 0 : i32
    return %c0_i32, %c0_i32_0 : i32, i32
  }
  func.func @transform_3(%arg0: i32) -> (i32, i32) {
    %c0_i32 = arith.constant 0 : i32
    %c0_i32_0 = arith.constant 0 : i32
    %c0_i32_1 = arith.constant 0 : i32
    return %c0_i32, %c0_i32_0 : i32, i32
  }
  func.func @transform_4(%arg0: i32) -> (i32, i32) {
    %c0_i32 = arith.constant 0 : i32
    %c0_i32_0 = arith.constant 0 : i32
    %c0_i32_1 = arith.constant 0 : i32
    return %c0_i32, %c0_i32_0 : i32, i32
  }
  func.func @transform_5(%arg0: i32) -> (i32, i32) {
    %c0_i32 = arith.constant 0 : i32
    %c0_i32_0 = arith.constant 0 : i32
    return %arg0, %c0_i32 : i32, i32
  }
}

</mosaic_0001>

<bundles_post_ra>
// kernel: cnn_text_forward.1
= control target key start
LH: loop header
LB: loop body
LE: loop exit
PB: predicated region body
PF: predicated region fallthrough
CT: control target
= control target key end

     0   :  { %vm41_vm0 = vsmask.f32 3328  ;;  %vm42_vm1 = vsmask.f32 7440  ;;  %vm110_vm3 = vcmask 261120   ;;  %vm260_vm4 = vcmask 1042432   ;;  %s1238_s0 = inlined_call_operand.vmem [shape: bf16[2,24,32], index: 0, kind: input, shape index: {}]   ;;  %s1239_s1 = inlined_call_operand.vmem [shape: bf16[5,32,128], index: 1, kind: input, shape index: {}]   ;;  %s1240_s2 = inlined_call_operand.vmem [shape: f32[16,128], index: 2, kind: input, shape index: {}]   ;;  %s1241_s3 = inlined_call_operand.vmem [shape: bf16[128,128], index: 3, kind: input, shape index: {}]   ;;  %s1242_s4 = inlined_call_operand.vmem [shape: f32[1,128], index: 4, kind: input, shape index: {}]   ;;  %s1243_s5 = inlined_call_operand.hbm [shape: f32[2,128], index: 5, kind: output, shape index: {}]  }
   0x1   :  { %v939_v0 = vld [vmem:[%s1239_s1 + $0x10] sm:$0xff]   ;;  %v940_v1 = vld [vmem:[%s1239_s1 + $0x18] sm:$0xff]   ;;  %v30_v2 = vld [vmem:[%s1238_s0] sm:$0xf]  ;;  %vm261_vm5 = vcmask 1046532  }
   0x2   :  { %860 = vmatprep.subr.bf16.mxu0 %v939_v0  ;;  %v31_v3 = vld [vmem:[%s1238_s0 + $0x4] sm:$0xf]  ;;  %v32_v4 = vld [vmem:[%s1238_s0 + $0x8] sm:$0x1]  ;;  %v45_v5 = vshrl.u32 %v30_v2, 16  ;;  %v48_v6 = vshll.u32 %v30_v2, 16  ;;  %vm1045_vm2 = vmor %vm41_vm0, %vm42_vm1 }
   0x3   :  { %861 = vmatpush3.bf16.msra.mxu0 %v939_v0  ;;  %v54_v7 = vshll.u32 %v31_v3, 16  ;;  %v58_v8 = vshrl.u32 %v31_v3, 16  ;;  %v64_v9 = vshll.u32 %v32_v4, 16  ;;  %v941_v10 = vld [vmem:[%s1239_s1] sm:$0xff]   ;;  %v33_v13 = vld [vmem:[%s1238_s0 + $0xc] sm:$0xf]  ;;  %vm1084_vm6 = vmor %vm260_vm4, %vm261_vm5 }
   0x4   :  { %862 = vmatprep.subr.bf16.mxu0 %v940_v1  ;;  %v47_v11 = vrot.slane %v45_v5, 4  ;;  %v50_v12 = vrot.slane %v48_v6, 5  ;;  %v34_v17 = vld [vmem:[%s1238_s0 + $0x10] sm:$0xf]  ;;  %v69_v18 = vshrl.u32 %v33_v13, 16  ;;  %v72_v21 = vshll.u32 %v33_v13, 16 }
   0x5   :  { %v56_v14 = vrot.slane %v54_v7, 5  ;;  %v60_v15 = vrot.slane %v58_v8, 4  ;;  %v66_v16 = vrot.slane %v64_v9, 5  ;;  %v35_v20 = vld [vmem:[%s1238_s0 + $0x14] sm:$0x1]  ;;  %v78_v22 = vshll.u32 %v34_v17, 16 }
   0x6   :  { %v51_v19 = vor.u32 %v50_v12, %v47_v11  ;;  %v82_v23 = vshrl.u32 %v34_v17, 16  ;;  %v71_v26 = vrot.slane %v69_v18, 4  ;;  %v88_v27 = vshll.u32 %v35_v20, 16  ;;  %v243_v41 = vld [vmem:[%s1238_s0] sm:$0xe]  ;;  %v942_v48 = vld [vmem:[%s1239_s1 + $0x8] sm:$0xff]  }
   0x7   :  { %863 = vmatpush3.bf16.msra.mxu0 %v940_v1  ;;  %v61_v25 = vor.u32 %v60_v15, %v56_v14  ;;  %v74_v29 = vrot.slane %v72_v21, 5  ;;  %v80_v30 = vrot.slane %v78_v22, 5  ;;  %v244_v42 = vld [vmem:[%s1238_s0 + $0x4] sm:$0xf]  ;;  %v245_v49 = vld [vmem:[%s1238_s0 + $0x8] sm:$0x1] }
   0x8   :  { %868 = vmatprep.subr.bf16.mxu0 %v941_v10  ;;  %v52_v28 = vrot.slane %v51_v19, 4  ;;  %v84_v31 = vrot.slane %v82_v23, 4  ;;  %v90_v33 = vrot.slane %v88_v27, 5  ;;  %v943_v45 = vld [vmem:[%s1238_s0] sm:$0xff]   ;;  %v265_v46 = vrot.slane %v244_v42, 5  ;;  %v945_v8 = vld [vmem:[%s1238_s0 + $0xc] sm:$0xff]  }
   0x9   :  { %v62_v32 = vrot.slane %v61_v25, 4  ;;  %v75_v35 = vor.u32 %v74_v29, %v71_v26  ;;  %v792_v50 = vrot.slane %v243_v41, 9  ;;  %v268_v52 = vrot.slane %v245_v49, 5  ;;  %v354_v53 = vld [vmem:[%s1238_s0] sm:$0xe]  ;;  %v946_v17 = vld [vmem:[%s1239_s1 + $0x28] sm:$0xff]  }
   0xa   :  { %v57_v34 = vsel %vm1045_vm2, %v52_v28, %v56_v14  ;;  %v85_v36 = vor.u32 %v84_v31, %v80_v30  ;;  %v267_v51 = vrot.slane %v265_v46, 4  ;;  %v355_v54 = vld [vmem:[%s1238_s0 + $0x4] sm:$0xf]  ;;  %v356_v57 = vld [vmem:[%s1238_s0 + $0x8] sm:$0x3]  ;;  %v369_v58 = vshrl.u32 %v354_v53, 16 }
   0xb   :  { %v67_v37 = vsel %vm1045_vm2, %v62_v32, %v66_v16  ;;  %v76_v39 = vrot.slane %v75_v35, 4  ;;  %v944_v55 = vld [vmem:[%s1239_s1 + $0x20] sm:$0xff]   ;;  %v372_v59 = vshll.u32 %v354_v53, 16  ;;  %v378_v60 = vshrl.u32 %v355_v54, 16  ;;  %v247_v61 = vld [vmem:[%s1238_s0 + $0x10] sm:$0xf] }
   0xc   :  { %v776_v38 = vcombine.low %v57_v34, %v67_v37  ;;  %v86_v40 = vrot.slane %v85_v36, 4  ;;  %v381_v62 = vshll.u32 %v355_v54, 16  ;;  %v266_v63 = vsel %vm1084_vm6, %v792_v50, %v265_v46  ;;  %v357_v7 = vld [vmem:[%s1238_s0 + $0xc] sm:$0xe]  ;;  %v358_v12 = vld [vmem:[%s1238_s0 + $0x10] sm:$0xf] }
   0xd   :  { %v81_v43 = vsel %vm1045_vm2, %v76_v39, %v80_v30  ;;  %v269_v0 = vsel %vm1084_vm6, %v267_v51, %v268_v52  ;;  %v388_v1 = vshrl.u32 %v356_v57, 16  ;;  %v391_v2 = vshll.u32 %v356_v57, 16  ;;  %v246_v9 = vld [vmem:[%s1238_s0 + $0xc] sm:$0xe]  ;;  %v359_v23 = vld [vmem:[%s1238_s0 + $0x14] sm:$0x3] }
   0xe   :  { %864 = vmatprep.mubr.msk.bf16.mxu0 %vm110_vm3, %v776_v38  ;;  %v91_v44 = vsel %vm1045_vm2, %v86_v40, %v90_v33  ;;  %v371_v3 = vrot.slane %v369_v58, 5  ;;  %v374_v4 = vrot.slane %v372_v59, 6  ;;  %v380_v5 = vrot.slane %v378_v60, 5  ;;  %v947_v25 = vld [vmem:[%s1239_s1 + $0x30] sm:$0xff]   ;;  %v951_v30 = vld [vmem:[%s1241_s3] sm:$0xff]  }
   0xf   :  { %v777_v47 = vcombine.low %v81_v43, %v91_v44  ;;  %v383_v6 = vrot.slane %v381_v62, 6  ;;  %v272_v11 = vrot.slane %v247_v61, 5  ;;  %v794_v13 = vcombine.low %v266_v63, %v269_v0  ;;  %v502_v42 = vld [vmem:[%s1238_s0 + $0x4] sm:$0xf] }
  0x10   :  { %v390_v14 = vrot.slane %v388_v1, 5  ;;  %v393_v15 = vrot.slane %v391_v2, 6  ;;  %v397_v16 = vshrl.u32 %v357_v7, 16  ;;  %v375_v18 = vor.u32 %v374_v4, %v371_v3 }
  0x11   :  { %865 = vmatmul.mubr.msk.bf16.vlgmr.msra.gmra.mrb[0].mxu0 %vm110_vm3, %v777_v47  ;;  %v384_v19 = vor.u32 %v383_v6, %v380_v5  ;;  %v400_v20 = vshll.u32 %v357_v7, 16  ;;  %v793_v21 = vrot.slane %v246_v9, 9  ;;  %v406_v24 = vshrl.u32 %v358_v12, 16 }
  0x12   :  { %869 = vmatpush3.bf16.msra.mxu0 %v941_v10  ;;  %872 = vmatprep.mubr.msk.bf16.mxu0 %vm110_vm3, %v943_v45  ;;  %v248_v10 = vld [vmem:[%s1238_s0 + $0x14] sm:$0x1]  ;;  %v274_v26 = vrot.slane %v272_v11, 4  ;;  %vm365_vm7 = vsmask.f32 2304  ;;  %v409_v27 = vshll.u32 %v358_v12, 16  ;;  %v394_v28 = vor.u32 %v393_v15, %v390_v14 }
  0x13   :  { %870 = vmatprep.subr.bf16.mxu0 %v942_v48  ;;  %v275_v22 = vrot.slane %v248_v10, 5  ;;  %vm366_vm8 = vsmask.f32 6416  ;;  %v399_v29 = vrot.slane %v397_v16, 5  ;;  %v376_v31 = vrot.slane %v375_v18, 4 }
  0x14   :  { %v386_v32 = vrot.slane %v384_v19, 4  ;;  %v402_v33 = vrot.slane %v400_v20, 6  ;;  %v416_v34 = vshrl.u32 %v359_v23, 16  ;;  %vm1127_vm9 = vmor %vm365_vm7, %vm366_vm8  ;;  %v408_v36 = vrot.slane %v406_v24, 5 }
  0x15   :  { %v411_v37 = vrot.slane %v409_v27, 6  ;;  %v419_v38 = vshll.u32 %v359_v23, 16  ;;  %v983_v39 = vmov 0.0   ;;  %v273_v40 = vsel %vm1084_vm6, %v793_v21, %v272_v11 }
  0x16   :  { %871 = vmatpush3.bf16.msra.mxu0 %v942_v48  ;;  %900 = vmatprep.subr.bf16.mxu1 %v983_v39  ;;  %v276_v41 = vsel %vm1084_vm6, %v274_v26, %v275_v22  ;;  %v385_v43 = vsel %vm1127_vm9, %v376_v31, %v384_v19  ;;  %v395_v44 = vsel %vm1127_vm9, %v386_v32, %v394_v28  ;;  %v418_v46 = vrot.slane %v416_v34, 5 }
  0x17   :  { %876 = vmatprep.subr.bf16.mxu0 %v944_v55  ;;  %901 = vmatpush3.bf16.msra.mxu1 %v951_v30  ;;  %v795_v45 = vcombine.low %v273_v40, %v276_v41 }
  0x18   :  { %902 = vmatprep.subr.bf16.mxu1 %v983_v39 }
  0x1d   :  { %873 = vmatmul.mubr.msk.bf16.vlgmr.msra.gmra.mrb[0].mxu0 %vm110_vm3, %v945_v8 }
  0x1e   :  { %877 = vmatpush3.bf16.msra.mxu0 %v944_v55  ;;  %880 = vmatprep.mubr.msk.bf16.mxu0 %vm110_vm3, %v794_v13 }
  0x1f   :  { %878 = vmatprep.subr.bf16.mxu0 %v946_v17 }
  0x22   :  { %879 = vmatpush3.bf16.msra.mxu0 %v946_v17 }
  0x23   :  { %884 = vmatprep.subr.bf16.mxu0 %v947_v25 }
  0x24   :  { %10 = vsyncpa [#allocation3], 0  ;;  %v804_v47 = vcombine.low %v385_v43, %v395_v44  ;;  %v403_v48 = vor.u32 %v402_v33, %v399_v29  ;;  %v412_v49 = vor.u32 %v411_v37, %v408_v36  ;;  %v421_v50 = vrot.slane %v419_v38, 6  ;;  %v948_v51 = vld [vmem:[%s1239_s1 + $0x38] sm:$0xff]   ;;  %v501_v53 = vld [vmem:[%s1238_s0] sm:$0xc] }
  0x25   :  { %v523_v52 = vrot.slane %v502_v42, 6  ;;  %v503_v54 = vld [vmem:[%s1238_s0 + $0x8] sm:$0x3]  ;;  %vm518_vm10 = vcmask 1041408   ;;  %vm519_vm11 = vcmask 1045508   ;;  %v949_v58 = vld [vmem:[%s1239_s1 + $0x40] sm:$0xff]  }
  0x26   :  { %v404_v55 = vrot.slane %v403_v48, 4  ;;  %v414_v56 = vrot.slane %v412_v49, 4  ;;  %v422_v57 = vor.u32 %v421_v50, %v418_v46  ;;  %v814_v59 = vrot.slane %v501_v53, 10  ;;  %vm1158_vm12 = vmor %vm518_vm10, %vm519_vm11  ;;  %v505_v3 = vld [vmem:[%s1238_s0 + $0x10] sm:$0xf]  ;;  %v950_v7 = vld [vmem:[%s1239_s1 + $0x48] sm:$0xff]  }
  0x27   :  { %v525_v60 = vrot.slane %v523_v52, 4  ;;  %v526_v61 = vrot.slane %v503_v54, 6  ;;  %v530_v6 = vrot.slane %v505_v3, 6  ;;  %v504_v8 = vld [vmem:[%s1238_s0 + $0xc] sm:$0xc]  ;;  %v953_v17 = vld [vmem:[%s1241_s3 + $0x10] sm:$0xff]  }
  0x28   :  { %v413_v63 = vsel %vm1127_vm9, %v404_v55, %v412_v49  ;;  %v423_v0 = vsel %vm1127_vm9, %v414_v56, %v422_v57  ;;  %v524_v1 = vsel %vm1158_vm12, %v814_v59, %v523_v52  ;;  %v506_v9 = vld [vmem:[%s1238_s0 + $0x14] sm:$0x3]  ;;  %v815_v10 = vrot.slane %v504_v8, 10  ;;  %v952_v16 = vld [vmem:[%s1241_s3 + $0x8] sm:$0xff]   ;;  %v954_v18 = vld [vmem:[%s1241_s3 + $0x18] sm:$0xff]   ;;  %s985_s8 = smov [#allocation2]  }
  0x29   :  { %881 = vmatmul.mubr.msk.bf16.vlgmr.msra.gmra.mrb[0].mxu0 %vm110_vm3, %v795_v45  ;;  %v527_v2 = vsel %vm1158_vm12, %v525_v60, %v526_v61  ;;  %v805_v4 = vcombine.low %v413_v63, %v423_v0  ;;  %v532_v11 = vrot.slane %v530_v6, 4  ;;  %v533_v12 = vrot.slane %v506_v9, 6  ;;  %903 = vmatpush3.bf16.msra.mxu1 %v952_v16  ;;  %v955_v19 = vld [vmem:[%s1241_s3 + $0x20] sm:$0xff]   ;;  %v956_v20 = vld [vmem:[%s1241_s3 + $0x28] sm:$0xff]   ;;  %v957_v21 = vld [vmem:[%s1241_s3 + $0x30] sm:$0xff]   ;;  %s764_s9 = sshll.u32 %s985_s8, 4  ;;  %s765_s9 = int_to_ptr.vmem [resolvable:$true] %s764_s9 }
  0x2a   :  { %885 = vmatpush3.bf16.msra.mxu0 %v947_v25  ;;  %888 = vmatprep.mubr.msk.bf16.mxu0 %vm110_vm3, %v804_v47  ;;  %v816_v5 = vcombine.low %v524_v1, %v527_v2  ;;  %v531_v13 = vsel %vm1158_vm12, %v815_v10, %v530_v6  ;;  %vm984_vm13 = vmmov 0   ;;  %v958_v22 = vld [vmem:[%s1241_s3 + $0x38] sm:$0xff]   ;;  %v612_v23 = vld [vmem:[%s1240_s2] sm:$0xff]  ;;  %v613_v25 = vld [vmem:[%s1240_s2 + $0x8] sm:$0xff]  ;;  %vm665_vm14 = vcmask 1041409   ;;  %s959_s10 = scalar_lea.vmem %s765_s9, 32  ;;  %p964_p1 = scmp.lt.s32.totalorder %s765_s9, %s765_s9 }
  0x2b   :  { %886 = vmatprep.subr.bf16.mxu0 %v948_v51  ;;  %v534_v14 = vsel %vm1158_vm12, %v532_v11, %v533_v12  ;;  %904 = vmatprep.subr.bf16.mxu1 %v983_v39  ;;  %v822_v57 = vld [vmem:[%s1242_s4] ss:$0 sm:$0xff]  ;;  %p960_p0 = scmp.ne.s32.totalorder %s765_s9, %s959_s10  ;;  %p965_p2 = scmp.lt.s32.totalorder %s959_s10, %s959_s10 }
  0x2c   :  { %v817_v15 = vcombine.low %v531_v13, %v534_v14  ;;  %916 = vmatprep.mubr.msk.bf16.mxu1 %vm984_vm13, %v983_v39 }
  0x2d   :  { %905 = vmatpush3.bf16.msra.mxu1 %v953_v17  ;;  %p966_p3 = por %p965_p2, %p964_p1 }
  0x2e   :  { %887 = vmatpush3.bf16.msra.mxu0 %v948_v51  ;;  %906 = vmatprep.subr.bf16.mxu1 %v983_v39 }
  0x2f   :  { %892 = vmatprep.subr.bf16.mxu0 %v949_v58  ;;  %p967_p4 = pnand %p966_p3, %p960_p0 }
  0x31   :  { %907 = vmatpush3.bf16.msra.mxu1 %v954_v18 }
  0x32   :  { %908 = vmatprep.subr.bf16.mxu1 %v983_v39 }
  0x35   :  { %889 = vmatmul.mubr.msk.bf16.vlgmr.msra.gmra.mrb[0].mxu0 %vm110_vm3, %v805_v4  ;;  %909 = vmatpush3.bf16.msra.mxu1 %v955_v19 }
  0x36   :  { %893 = vmatpush3.bf16.msra.mxu0 %v949_v58  ;;  %896 = vmatprep.mubr.msk.bf16.mxu0 %vm110_vm3, %v816_v5 }
  0x37   :  { %894 = vmatprep.subr.bf16.mxu0 %v950_v7  ;;  %910 = vmatprep.subr.bf16.mxu1 %v983_v39 }
  0x39   :  { %911 = vmatpush3.bf16.msra.mxu1 %v956_v20 }
  0x3a   :  { %895 = vmatpush3.bf16.msra.mxu0 %v950_v7  ;;  %912 = vmatprep.subr.bf16.mxu1 %v983_v39 }
  0x3d   :  { %913 = vmatpush3.bf16.msra.mxu1 %v957_v21 }
  0x3e   :  { %914 = vmatprep.subr.bf16.mxu1 %v983_v39 }
  0x41   :  { %897 = vmatmul.mubr.msk.bf16.vlgmr.msra.gmra.mrb[0].mxu0 %vm110_vm3, %v817_v15  ;;  %915 = vmatpush3.bf16.msra.mxu1 %v958_v22 }
 0x114   :  { %v898_v24 = vpop.f32.mrb[0].mxu0 }
 0x115   :  { %v616_v26 = vadd.f32 %v898_v24, %v612_v23  ;;  %v593_v27 = vpop.f32.mrb[1].mxu0 }
 0x116   :  { %v614_v28 = vadd.f32 %v612_v23, %v593_v27  ;;  %v899_v29 = vpop.f32.mrb[2].mxu0 }
 0x117   :  { %v617_v30 = vadd.f32 %v899_v29, %v613_v25  ;;  %v596_v31 = vpop.f32.mrb[3].mxu0  ;;  %v620_v33 = vmax.f32 %v616_v26, 0.0 }
 0x118   :  { %v615_v32 = vadd.f32 %v613_v25, %v596_v31  ;;  %v618_v35 = vmax.f32 %v614_v28, 0.0 }
 0x119   :  { %v621_v34 = vmax.f32 %v617_v30, 0.0 }
 0x11a   :  { %v619_v36 = vmax.f32 %v615_v32, 0.0 }
 0x11b   :  { %v629_v37 = vmax.f32 %v620_v33, %v621_v34 }
 0x11c   :  { %v622_v38 = vmax.f32 %v618_v35, %v619_v36 }
 0x11d   :  { %v630_v39 = vrot.slane %v629_v37, 4 }
 0x11e   :  { %v623_v40 = vrot.slane %v622_v38, 4 }
 0x11f   :  { %v631_v41 = vmax.f32 %v629_v37, %v630_v39 }
 0x120   :  { %v624_v42 = vmax.f32 %v622_v38, %v623_v40 }
 0x121   :  { %v632_v43 = vrot.slane %v631_v41, 2 }
 0x122   :  { %v625_v44 = vrot.slane %v624_v42, 2 }
 0x123   :  { %v633_v45 = vmax.f32 %v631_v41, %v632_v43 }
 0x124   :  { %v626_v46 = vmax.f32 %v624_v42, %v625_v44 }
 0x125   :  { %v634_v47 = vrot.slane %v633_v45, 1 }
 0x126   :  { %v627_v48 = vrot.slane %v626_v46, 1 }
 0x127   :  { %v635_v49 = vmax.f32 %v633_v45, %v634_v47 }
 0x128   :  { %v628_v50 = vmax.f32 %v626_v46, %v627_v48 }
 0x129   :  { %v637_v51 = vpack.c.bf16 %v635_v49, %v635_v49 }
 0x12a   :  { %v636_v52 = vpack.c.bf16 %v628_v50, %v628_v50 }
 0x12b   :  { %v664_v53 = vunpack.c.l.b16 %v637_v51 }
 0x12c   :  { %v663_v54 = vunpack.c.l.b16 %v636_v52 }
 0x12e   :  { %v666_v55 = vsel %vm665_vm14, %v664_v53, %v663_v54 }
 0x12f   :  { %v667_v56 = vpack.c.b16 %v666_v55, %v666_v55 }
 0x131   :  { %917 = vmatmul.mubr.bf16.vlgmr.msra.gmra.mrb[0].mxu1 %v667_v56 }
 0x204   :  { %v751_v58 = vpop.f32.mrb[0].mxu1 }
 0x205   :  { %v752_v59 = vadd.f32 %v822_v57, %v751_v58  ;;  %v918_v60 = vpop.f32.mrb[1].mxu1 }
 0x206   :  { %v754_v61 = vpop.f32.mrb[2].mxu1 }
 0x207   :  { %757 = vst [vmem:[#allocation2] sm:$0x3] %v752_v59  ;;  %v919_v62 = vpop.f32.mrb[3].mxu1 }
 0x208   :  { %970 = shalt.err (!%p967_p4)
}
 0x209   :  { %s971_s4 = scalar_lea.hbm %s1243_s5, 32 }
 0x20a   :  { %p972_p5 = scmp.ne.s32.totalorder %s1243_s5, %s971_s4  ;;  %p975_p6 = scmp.lt.u32.totalorder %s971_s4, %s1243_s5 }
 0x20c   :  { %p977_p7 = pnand %p975_p6, %p972_p5 }
 0x20e   :  { %980 = shalt.err (!%p977_p7)
}
 0x20f   :  { %767 = dma.vmem_to_hbm [thread:$0]  %s765_s9, 32, %s1243_s5, [#allocation3]  }
 0x210   :  { %981 = dma.done.wait [#allocation3], 32  }
 0x211   :  { %982 = vsyncadd [#allocation3], 4294967264 }
 0x212   :  { %771 = vsyncpa [#allocation3], 1 }

</bundles_post_ra>
